<compile_context>
chip_gen: v6e
topology: v6e:2x2x1
jax: 0.10.0
libtpu: 0.0.40
codegen_flags: <defaults>
</compile_context>

<pallas_src>
import functools

import jax
import jax.numpy as jnp
from jax.experimental import pallas as pl
from jax.experimental.pallas import tpu as pltpu


def _make_nearest_kernel(d_runs):
    """d_runs: static tuple of (src_depth, out_depth_start, out_depth_stop)."""

    def kernel(x_ref, shw_ref, o_ref):
        # x_ref  : VMEM (TB, D_in,  HW_in)   channel-batched input tile (native dtype)
        # shw_ref: VMEM (HW_in, HW_out)      pre-transposed H*W one-hot selector
        # o_ref  : VMEM (TB, D_out, HW_out)  lane-dense output tile
        shw = shw_ref[...]
        tb = o_ref.shape[0]
        hw_out = o_ref.shape[2]
        for d_src, lo, hi in d_runs:
            # H/W nearest gather as a one-hot MXU matmul: exact (single 1.0 per column),
            # f32 accumulate, lossless cast back.
            y = jnp.dot(x_ref[:, d_src, :], shw,
                        preferred_element_type=jnp.float32).astype(o_ref.dtype)
            if hi - lo == 1:
                o_ref[:, lo, :] = y
            else:
                # depth nearest = replication into a contiguous run of output depths
                o_ref[:, lo:hi, :] = jnp.broadcast_to(y[:, None, :],
                                                      (tb, hi - lo, hw_out))

    return kernel


@functools.partial(jax.jit, static_argnums=(1,))
def nearest_upsample_3d(x, output_size):
    """Pallas nearest-neighbor upsample of a 5D NCDHW tensor to output_size=(D,H,W)."""
    N, C, D_in, H_in, W_in = x.shape
    D_out, H_out, W_out = (int(s) for s in output_size)
    B = N * C
    HW_in = H_in * W_in
    HW_out = H_out * W_out
    dtype = x.dtype
    itemsize = jnp.dtype(dtype).itemsize

    # free row-major reshape: (N, C, D, H, W) -> (N*C, D, H*W)
    x_flat = x.reshape(B, D_in, HW_in)

    # ---- static (Python-int) depth source indices, grouped into contiguous runs ----
    d_src = [(d * D_in) // D_out for d in range(D_out)]
    d_runs = []
    lo = 0
    while lo < D_out:
        hi = lo
        while hi < D_out and d_src[hi] == d_src[lo]:
            hi += 1
        d_runs.append((d_src[lo], lo, hi))
        lo = hi
    d_runs = tuple(d_runs)

    # ---- H*W one-hot selector (exact 0/1 entries, pre-transposed: out = x @ S_hw) ----
    h_src = (jnp.arange(H_out, dtype=jnp.int32) * H_in) // H_out          # (H_out,)
    w_src = (jnp.arange(W_out, dtype=jnp.int32) * W_in) // W_out          # (W_out,)
    hw_src = (h_src[:, None] * W_in + w_src[None, :]).reshape(-1)         # (HW_out,)
    s_hw = (jnp.arange(HW_in, dtype=jnp.int32)[:, None]
            == hw_src[None, :]).astype(dtype)                             # (HW_in, HW_out)

    # ---- channel-batch tile size: MiB-scale, double-buffered blocks + selector must
    #      stay inside the 32 MiB scoped-VMEM request (well under v7x's 64 MiB). ----
    sel_bytes = HW_in * HW_out * itemsize
    per_row_bytes = (D_in * HW_in + D_out * HW_out) * itemsize
    budget = 20 * 1024 * 1024
    avail = budget - 2 * sel_bytes
    TB = max(1, min(B, avail // (2 * max(per_row_bytes, 1))))
    if TB >= 8:
        TB = (TB // 8) * 8
    grid = (pl.cdiv(B, TB),)

    flops = 2 * B * len(d_runs) * HW_in * HW_out
    bytes_accessed = (B * D_in * HW_in + B * D_out * HW_out + HW_in * HW_out) * itemsize

    out = pl.pallas_call(
        _make_nearest_kernel(d_runs),
        out_shape=jax.ShapeDtypeStruct((B, D_out, HW_out), dtype),
        grid=grid,
        in_specs=[
            pl.BlockSpec((TB, D_in, HW_in), lambda i: (i, 0, 0)),
            pl.BlockSpec((HW_in, HW_out), lambda i: (0, 0)),   # constant index -> fetched once
        ],
        out_specs=pl.BlockSpec((TB, D_out, HW_out), lambda i: (i, 0, 0)),
        compiler_params=pltpu.CompilerParams(
            dimension_semantics=("parallel",),
            vmem_limit_bytes=32 * 1024 * 1024,
        ),
        cost_estimate=pl.CostEstimate(
            flops=flops, transcendentals=0, bytes_accessed=bytes_accessed),
    )(x_flat, s_hw)

    # free row-major reshape back to NCDHW
    return out.reshape(N, C, D_out, H_out, W_out)


class AbstractUpsampling:
    """JAX/Pallas port: forward(encoder_features, x) upsamples x to encoder_features' spatial size."""

    def __init__(self, upsample):
        self.upsample = upsample

    def __call__(self, encoder_features, x):
        output_size = encoder_features.shape[2:]
        return self.upsample(x, output_size)


def _nearest_reference(x, output_size):
    D_out, H_out, W_out = output_size
    D_in, H_in, W_in = x.shape[2:]
    d_src = (jnp.arange(D_out) * D_in) // D_out
    h_src = (jnp.arange(H_out) * H_in) // H_out
    w_src = (jnp.arange(W_out) * W_in) // W_out
    return x[:, :, d_src][:, :, :, h_src][:, :, :, :, w_src]


if __name__ == "__main__":
    key = jax.random.PRNGKey(0)
    k1, k2, k3 = jax.random.split(key, 3)

    module = AbstractUpsampling(upsample=nearest_upsample_3d)

    # Test 1: typical decoder step (2x in every spatial dim).
    x = jax.random.normal(k1, (2, 4, 4, 8, 8), dtype=jnp.float32)                   # (N, C, D, H, W)
    encoder_features = jax.random.normal(k2, (2, 8, 8, 16, 16), dtype=jnp.float32)
    out = jax.block_until_ready(module(encoder_features, x))
    ref = _nearest_reference(x, encoder_features.shape[2:])
    assert out.shape == (2, 4, 8, 16, 16)
    assert out.dtype == x.dtype
    assert jnp.array_equal(out, ref), "mismatch vs nearest-neighbor reference (2x case)"

    # Test 2: non-integer scale factors (arbitrary output_size).
    x2 = jax.random.normal(k3, (1, 3, 3, 5, 7), dtype=jnp.float32)
    out2 = jax.block_until_ready(nearest_upsample_3d(x2, (5, 7, 9)))
    ref2 = _nearest_reference(x2, (5, 7, 9))
    assert out2.shape == (1, 3, 5, 7, 9)
    assert jnp.array_equal(out2, ref2), "mismatch vs nearest-neighbor reference (non-integer case)"

    print("KERNEL_OK")
</pallas_src>

<mosaic_0001>
module attributes {stable_mosaic.version = 11 : i64} {
  func.func @kernel(%arg0: i32, %arg1: memref<8x4x64xf32, #tpu.memory_space<vmem>>, %arg2: memref<64x256xf32, #tpu.memory_space<vmem>>, %arg3: memref<8x8x256xf32, #tpu.memory_space<vmem>>) attributes {dimension_semantics = [#tpu.dimension_semantics<parallel>], iteration_bounds = array<i64: 1>, scalar_prefetch = 0 : i64, scratch_operands = 0 : i64, tpu.core_type = #tpu.core_type<tc>, window_params = [{transform_indices = @transform_0, window_bounds = array<i64: 8, 4, 64>}, {pipeline_mode = #tpu.pipeline_mode<synchronous>, transform_indices = @transform_1, window_bounds = array<i64: 64, 256>}, {transform_indices = @transform_2, window_bounds = array<i64: 8, 8, 256>}]} {
    %c0 = arith.constant 0 : index
    %c0_0 = arith.constant 0 : index
    %0 = vector.load %arg2[%c0, %c0_0] : memref<64x256xf32, #tpu.memory_space<vmem>>, vector<64x256xf32>
    %c0_1 = arith.constant 0 : index
    %c0_2 = arith.constant 0 : index
    %c0_3 = arith.constant 0 : index
    %1 = vector.load %arg1[%c0_1, %c0_2, %c0_3] : memref<8x4x64xf32, #tpu.memory_space<vmem>>, vector<8x1x64xf32>
    %2 = vector.shape_cast %1 : vector<8x1x64xf32> to vector<8x64xf32>
    %cst = arith.constant dense<0.000000e+00> : vector<8x256xf32>
    %3 = tpu.matmul %2, %0, %cst {dimension_numbers = #tpu.dot_dimension_numbers<[1], [0], [0], [1], [0, 0, 1, 1], [], []>} : vector<8x64xf32>, vector<64x256xf32>, vector<8x256xf32> -> vector<8x256xf32>
    %4 = vector.shape_cast %3 : vector<8x256xf32> to vector<8x1x256xf32>
    %5 = vector.shape_cast %4 : vector<8x1x256xf32> to vector<8x1x256xf32>
    %6 = vector.broadcast %5 : vector<8x1x256xf32> to vector<8x2x256xf32>
    %c0_4 = arith.constant 0 : index
    %c0_5 = arith.constant 0 : index
    %c0_6 = arith.constant 0 : index
    %7 = vector.load %arg3[%c0_4, %c0_5, %c0_6] : memref<8x8x256xf32, #tpu.memory_space<vmem>>, vector<8x2x256xf32>
    tpu.vector_store %arg3[%c0_4, %c0_5, %c0_6], %6 {strides = array<i32>} : memref<8x8x256xf32, #tpu.memory_space<vmem>>, vector<8x2x256xf32>,
    %c0_7 = arith.constant 0 : index
    %c1 = arith.constant 1 : index
    %c0_8 = arith.constant 0 : index
    %8 = vector.load %arg1[%c0_7, %c1, %c0_8] : memref<8x4x64xf32, #tpu.memory_space<vmem>>, vector<8x1x64xf32>
    %9 = vector.shape_cast %8 : vector<8x1x64xf32> to vector<8x64xf32>
    %cst_9 = arith.constant dense<0.000000e+00> : vector<8x256xf32>
    %10 = tpu.matmul %9, %0, %cst_9 {dimension_numbers = #tpu.dot_dimension_numbers<[1], [0], [0], [1], [0, 0, 1, 1], [], []>} : vector<8x64xf32>, vector<64x256xf32>, vector<8x256xf32> -> vector<8x256xf32>
    %11 = vector.shape_cast %10 : vector<8x256xf32> to vector<8x1x256xf32>
    %12 = vector.shape_cast %11 : vector<8x1x256xf32> to vector<8x1x256xf32>
    %13 = vector.broadcast %12 : vector<8x1x256xf32> to vector<8x2x256xf32>
    %c0_10 = arith.constant 0 : index
    %c2 = arith.constant 2 : index
    %c0_11 = arith.constant 0 : index
    %14 = vector.load %arg3[%c0_10, %c2, %c0_11] : memref<8x8x256xf32, #tpu.memory_space<vmem>>, vector<8x2x256xf32>
    tpu.vector_store %arg3[%c0_10, %c2, %c0_11], %13 {strides = array<i32>} : memref<8x8x256xf32, #tpu.memory_space<vmem>>, vector<8x2x256xf32>,
    %c0_12 = arith.constant 0 : index
    %c2_13 = arith.constant 2 : index
    %c0_14 = arith.constant 0 : index
    %15 = vector.load %arg1[%c0_12, %c2_13, %c0_14] : memref<8x4x64xf32, #tpu.memory_space<vmem>>, vector<8x1x64xf32>
    %16 = vector.shape_cast %15 : vector<8x1x64xf32> to vector<8x64xf32>
    %cst_15 = arith.constant dense<0.000000e+00> : vector<8x256xf32>
    %17 = tpu.matmul %16, %0, %cst_15 {dimension_numbers = #tpu.dot_dimension_numbers<[1], [0], [0], [1], [0, 0, 1, 1], [], []>} : vector<8x64xf32>, vector<64x256xf32>, vector<8x256xf32> -> vector<8x256xf32>
    %18 = vector.shape_cast %17 : vector<8x256xf32> to vector<8x1x256xf32>
    %19 = vector.shape_cast %18 : vector<8x1x256xf32> to vector<8x1x256xf32>
    %20 = vector.broadcast %19 : vector<8x1x256xf32> to vector<8x2x256xf32>
    %c0_16 = arith.constant 0 : index
    %c4 = arith.constant 4 : index
    %c0_17 = arith.constant 0 : index
    %21 = vector.load %arg3[%c0_16, %c4, %c0_17] : memref<8x8x256xf32, #tpu.memory_space<vmem>>, vector<8x2x256xf32>
    tpu.vector_store %arg3[%c0_16, %c4, %c0_17], %20 {strides = array<i32>} : memref<8x8x256xf32, #tpu.memory_space<vmem>>, vector<8x2x256xf32>,
    %c0_18 = arith.constant 0 : index
    %c3 = arith.constant 3 : index
    %c0_19 = arith.constant 0 : index
    %22 = vector.load %arg1[%c0_18, %c3, %c0_19] : memref<8x4x64xf32, #tpu.memory_space<vmem>>, vector<8x1x64xf32>
    %23 = vector.shape_cast %22 : vector<8x1x64xf32> to vector<8x64xf32>
    %cst_20 = arith.constant dense<0.000000e+00> : vector<8x256xf32>
    %24 = tpu.matmul %23, %0, %cst_20 {dimension_numbers = #tpu.dot_dimension_numbers<[1], [0], [0], [1], [0, 0, 1, 1], [], []>} : vector<8x64xf32>, vector<64x256xf32>, vector<8x256xf32> -> vector<8x256xf32>
    %25 = vector.shape_cast %24 : vector<8x256xf32> to vector<8x1x256xf32>
    %26 = vector.shape_cast %25 : vector<8x1x256xf32> to vector<8x1x256xf32>
    %27 = vector.broadcast %26 : vector<8x1x256xf32> to vector<8x2x256xf32>
    %c0_21 = arith.constant 0 : index
    %c6 = arith.constant 6 : index
    %c0_22 = arith.constant 0 : index
    %28 = vector.load %arg3[%c0_21, %c6, %c0_22] : memref<8x8x256xf32, #tpu.memory_space<vmem>>, vector<8x2x256xf32>
    tpu.vector_store %arg3[%c0_21, %c6, %c0_22], %27 {strides = array<i32>} : memref<8x8x256xf32, #tpu.memory_space<vmem>>, vector<8x2x256xf32>,
    return
  }
  func.func @transform_0(%arg0: i32) -> (i32, i32, i32) {
    %c0_i32 = arith.constant 0 : i32
    %c0_i32_0 = arith.constant 0 : i32
    %c0_i32_1 = arith.constant 0 : i32
    return %arg0, %c0_i32, %c0_i32_0 : i32, i32, i32
  }
  func.func @transform_1(%arg0: i32) -> (i32, i32) {
    %c0_i32 = arith.constant 0 : i32
    %c0_i32_0 = arith.constant 0 : i32
    %c0_i32_1 = arith.constant 0 : i32
    return %c0_i32, %c0_i32_0 : i32, i32
  }
  func.func @transform_2(%arg0: i32) -> (i32, i32, i32) {
    %c0_i32 = arith.constant 0 : i32
    %c0_i32_0 = arith.constant 0 : i32
    %c0_i32_1 = arith.constant 0 : i32
    return %arg0, %c0_i32, %c0_i32_0 : i32, i32, i32
  }
}

</mosaic_0001>

<bundles_post_ra>
// kernel: nearest_upsample_3d.1
= control target key start
LH: loop header
LB: loop body
LE: loop exit
PB: predicated region body
PF: predicated region fallthrough
CT: control target
= control target key end

     0   :  { %v1049_v3 = vmov 0.0   ;;  %vm44_vm0 = vcmask 1041409   ;;  %vm47_vm1 = vcmask 1042434   ;;  %vm50_vm2 = vcmask 1043459   ;;  %s1634_s1 = inlined_call_operand.vmem [shape: f32[64,256], index: 1, kind: input, shape index: {}]   ;;  %s1635_s0 = inlined_call_operand.vmem [shape: f32[8,4,64], index: 0, kind: input, shape index: {}]   ;;  %s1636_s2 = inlined_call_operand.vmem [shape: f32[8,8,256], index: 2, kind: output, shape index: {}]  }
   0x1   :  { %v1069_v0 = vld [vmem:[%s1634_s1 + $0x78] sm:$0xff]  ;;  %v1074_v1 = vld [vmem:[%s1634_s1 + $0x70] sm:$0xff]  ;;  %v1079_v2 = vld [vmem:[%s1634_s1 + $0x68] sm:$0xff]  ;;  %131 = vmatprep.mubr.f32.mxu0 %v1049_v3  ;;  %382 = vmatprep.mubr.f32.mxu1 %v1049_v3  ;;  %vm53_vm3 = vcmask 1044484   ;;  %vm56_vm4 = vcmask 1045509   ;;  %vm59_vm5 = vcmask 1046534  }
   0x2   :  { %83 = vmatprep.subr.mxu0 %v1069_v0  ;;  %334 = vmatprep.subr.mxu1 %v1069_v0  ;;  %v1088_v4 = vld [vmem:[%s1634_s1 + $0x60] sm:$0xff]  ;;  %v1095_v5 = vld [vmem:[%s1634_s1 + $0x58] sm:$0xff]  ;;  %v1102_v6 = vld [vmem:[%s1634_s1 + $0x50] sm:$0xff]  ;;  %vm62_vm6 = vcmask 1047559   ;;  %vm64_vm7 = vcmask 523264  }
   0x3   :  { %84 = vmatpush1.msra.mxu0 %v1074_v1  ;;  %335 = vmatpush1.msra.mxu1 %v1074_v1  ;;  %v1109_v7 = vld [vmem:[%s1634_s1 + $0x48] sm:$0xff]  ;;  %v1114_v8 = vld [vmem:[%s1634_s1 + $0x40] sm:$0xff]  ;;  %v1121_v9 = vld [vmem:[%s1634_s1 + $0x38] sm:$0xff] }
   0x4   :  { %85 = vmatprep.subr.mxu0 %v1079_v2  ;;  %336 = vmatprep.subr.mxu1 %v1079_v2  ;;  %v1126_v10 = vld [vmem:[%s1634_s1 + $0x30] sm:$0xff]  ;;  %v28_v11 = vld [vmem:[%s1635_s0 + $0x4] sm:$0x1]  ;;  %v1136_v12 = vld [vmem:[%s1634_s1 + $0x28] sm:$0xff] }
   0x5   :  { %86 = vmatpush1.msra.mxu0 %v1088_v4  ;;  %337 = vmatpush1.msra.mxu1 %v1088_v4  ;;  %v29_v13 = vld [vmem:[%s1635_s0 + $0x8] sm:$0x1]  ;;  %v30_v14 = vld [vmem:[%s1635_s0 + $0xc] sm:$0x1]  ;;  %v31_v15 = vld [vmem:[%s1635_s0 + $0x10] sm:$0x1] }
   0x6   :  { %87 = vmatprep.subr.mxu0 %v1095_v5  ;;  %338 = vmatprep.subr.mxu1 %v1095_v5  ;;  %v1152_v16 = vld [vmem:[%s1634_s1 + $0x20] sm:$0xff]  ;;  %v32_v18 = vld [vmem:[%s1635_s0 + $0x14] sm:$0x1]  ;;  %v33_v19 = vld [vmem:[%s1635_s0 + $0x18] sm:$0x1]  ;;  %v43_v22 = vrot.slane %v28_v11, 7 }
   0x7   :  { %88 = vmatpush1.msra.mxu0 %v1102_v6  ;;  %339 = vmatpush1.msra.mxu1 %v1102_v6  ;;  %v27_v17 = vld [vmem:[%s1635_s0] sm:$0x1]  ;;  %v1168_v20 = vld [vmem:[%s1634_s1 + $0x18] sm:$0xff]  ;;  %v46_v23 = vrot.slane %v29_v13, 6  ;;  %v49_v24 = vrot.slane %v30_v14, 5  ;;  %v1178_v25 = vld [vmem:[%s1634_s1 + $0x10] sm:$0xff] }
   0x8   :  { %89 = vmatprep.subr.mxu0 %v1109_v7  ;;  %340 = vmatprep.subr.mxu1 %v1109_v7  ;;  %v34_v21 = vld [vmem:[%s1635_s0 + $0x1c] sm:$0x1]  ;;  %v52_v26 = vrot.slane %v31_v15, 4  ;;  %v55_v27 = vrot.slane %v32_v18, 3  ;;  %v286_v28 = vld [vmem:[%s1635_s0 + $0x1] sm:$0x1]  ;;  %v45_v30 = vsel %vm44_vm0, %v43_v22, %v27_v17 }
   0x9   :  { %90 = vmatpush1.msra.mxu0 %v1114_v8  ;;  %341 = vmatpush1.msra.mxu1 %v1114_v8  ;;  %v287_v29 = vld [vmem:[%s1635_s0 + $0x5] sm:$0x1]  ;;  %v288_v31 = vld [vmem:[%s1635_s0 + $0x9] sm:$0x1]  ;;  %v289_v32 = vld [vmem:[%s1635_s0 + $0xd] sm:$0x1]  ;;  %v48_v34 = vsel %vm47_vm1, %v46_v23, %v45_v30 }
   0xa   :  { %91 = vmatprep.subr.mxu0 %v1121_v9  ;;  %342 = vmatprep.subr.mxu1 %v1121_v9  ;;  %v290_v33 = vld [vmem:[%s1635_s0 + $0x11] sm:$0x1]  ;;  %v58_v35 = vrot.slane %v33_v19, 2  ;;  %v61_v36 = vrot.slane %v34_v21, 1  ;;  %v291_v37 = vld [vmem:[%s1635_s0 + $0x15] sm:$0x1]  ;;  %v51_v40 = vsel %vm50_vm2, %v49_v24, %v48_v34 }
   0xb   :  { %92 = vmatpush1.msra.mxu0 %v1126_v10  ;;  %343 = vmatpush1.msra.mxu1 %v1126_v10  ;;  %v292_v38 = vld [vmem:[%s1635_s0 + $0x19] sm:$0x1]  ;;  %v1212_v39 = vld [vmem:[%s1634_s1 + $0x8] sm:$0xff]  ;;  %v293_v41 = vld [vmem:[%s1635_s0 + $0x1d] sm:$0x1]  ;;  %v302_v42 = vrot.slane %v287_v29, 7  ;;  %v54_v46 = vsel %vm53_vm3, %v52_v26, %v51_v40 }
   0xc   :  { %93 = vmatprep.subr.mxu0 %v1136_v12  ;;  %344 = vmatprep.subr.mxu1 %v1136_v12  ;;  %v304_v43 = vrot.slane %v288_v31, 6  ;;  %v306_v44 = vrot.slane %v289_v32, 5  ;;  %v1223_v45 = vld [vmem:[%s1634_s1] sm:$0xff]  ;;  %v308_v47 = vrot.slane %v290_v33, 4  ;;  %v57_v50 = vsel %vm56_vm4, %v55_v27, %v54_v46  ;;  %v539_v53 = vld [vmem:[%s1635_s0 + $0xa] sm:$0x1] }
   0xd   :  { %94 = vmatpush1.msra.mxu0 %v1152_v16  ;;  %345 = vmatpush1.msra.mxu1 %v1152_v16  ;;  %v537_v48 = vld [vmem:[%s1635_s0 + $0x2] sm:$0x1]  ;;  %v538_v49 = vld [vmem:[%s1635_s0 + $0x6] sm:$0x1]  ;;  %v303_v51 = vsel %vm44_vm0, %v302_v42, %v286_v28  ;;  %v310_v52 = vrot.slane %v291_v37, 3  ;;  %v60_v56 = vsel %vm59_vm5, %v58_v35, %v57_v50  ;;  %v312_v58 = vrot.slane %v292_v38, 2 }
   0xe   :  { %95 = vmatprep.subr.mxu0 %v1168_v20  ;;  %346 = vmatprep.subr.mxu1 %v1168_v20  ;;  %v540_v54 = vld [vmem:[%s1635_s0 + $0xe] sm:$0x1]  ;;  %v553_v55 = vrot.slane %v538_v49, 7  ;;  %v305_v57 = vsel %vm47_vm1, %v304_v43, %v303_v51  ;;  %v314_v59 = vrot.slane %v293_v41, 1  ;;  %v541_v60 = vld [vmem:[%s1635_s0 + $0x12] sm:$0x1]  ;;  %v63_v61 = vsel %vm62_vm6, %v61_v36, %v60_v56 }
   0xf   :  { %96 = vmatpush1.msra.mxu0 %v1178_v25  ;;  %347 = vmatpush1.msra.mxu1 %v1178_v25  ;;  %v307_v62 = vsel %vm50_vm2, %v306_v44, %v305_v57  ;;  %v555_v11 = vrot.slane %v539_v53, 6  ;;  %v542_v14 = vld [vmem:[%s1635_s0 + $0x16] sm:$0x1]  ;;  %v557_v15 = vrot.slane %v540_v54, 5  ;;  %v789_v17 = vld [vmem:[%s1635_s0 + $0x7] sm:$0x1] }
  0x10   :  { %97 = vmatprep.subr.mxu0 %v1212_v39  ;;  %348 = vmatprep.subr.mxu1 %v1212_v39  ;;  %v554_v63 = vsel %vm44_vm0, %v553_v55, %v537_v48  ;;  %v309_v13 = vsel %vm53_vm3, %v308_v47, %v307_v62  ;;  %v559_v21 = vrot.slane %v541_v60, 4  ;;  %v790_v22 = vld [vmem:[%s1635_s0 + $0xb] sm:$0x1]  ;;  %v791_v23 = vld [vmem:[%s1635_s0 + $0xf] sm:$0x1]  ;;  %v804_v30 = vrot.slane %v789_v17, 7 }
  0x11   :  { %98 = vmatpush1.msra.mxu0 %v1223_v45  ;;  %349 = vmatpush1.msra.mxu1 %v1223_v45  ;;  %v311_v18 = vsel %vm56_vm4, %v310_v52, %v309_v13  ;;  %v556_v19 = vsel %vm47_vm1, %v555_v11, %v554_v63  ;;  %v788_v26 = vld [vmem:[%s1635_s0 + $0x3] sm:$0x1]  ;;  %v792_v27 = vld [vmem:[%s1635_s0 + $0x13] sm:$0x1]  ;;  %v543_v29 = vld [vmem:[%s1635_s0 + $0x1a] sm:$0x1] }
  0x12   :  { %1043 = vmatmul.mubr.msk.f32.vlgmr.msra.gmra.mxu0 %vm64_vm7, %v63_v61  ;;  %585 = vmatprep.subr.mxu0 %v1069_v0  ;;  %v313_v24 = vsel %vm59_vm5, %v312_v58, %v311_v18  ;;  %v806_v31 = vrot.slane %v790_v22, 6  ;;  %v561_v32 = vrot.slane %v542_v14, 3  ;;  %v793_v33 = vld [vmem:[%s1635_s0 + $0x17] sm:$0x1]  ;;  %v808_v34 = vrot.slane %v791_v23, 5 }
  0x13   :  { %836 = vmatprep.subr.mxu1 %v1069_v0  ;;  %586 = vmatpush1.msra.mxu0 %v1074_v1  ;;  %v558_v0 = vsel %vm50_vm2, %v557_v15, %v556_v19  ;;  %v315_v28 = vsel %vm62_vm6, %v314_v59, %v313_v24  ;;  %v810_v35 = vrot.slane %v792_v27, 4  ;;  %v805_v37 = vsel %vm44_vm0, %v804_v30, %v788_v26  ;;  %v794_v41 = vld [vmem:[%s1635_s0 + $0x1b] sm:$0x1]  ;;  %v795_v46 = vld [vmem:[%s1635_s0 + $0x1f] sm:$0x1] }
  0x14   :  { %587 = vmatprep.subr.mxu0 %v1079_v2  ;;  %633 = vmatprep.mubr.f32.mxu0 %v1049_v3  ;;  %v560_v36 = vsel %vm53_vm3, %v559_v21, %v558_v0  ;;  %v807_v38 = vsel %vm47_vm1, %v806_v31, %v805_v37  ;;  %v563_v40 = vrot.slane %v543_v29, 2 }
  0x15   :  { %588 = vmatpush1.msra.mxu0 %v1088_v4  ;;  %1044 = vmatmul.mubr.msk.f32.vlgmr.msra.gmra.mxu1 %vm64_vm7, %v315_v28  ;;  %v809_v42 = vsel %vm50_vm2, %v808_v34, %v807_v38 }
  0x16   :  { %589 = vmatprep.subr.mxu0 %v1095_v5  ;;  %837 = vmatpush1.msra.mxu1 %v1074_v1  ;;  %v544_v1 = vld [vmem:[%s1635_s0 + $0x1e] sm:$0x1]  ;;  %v811_v43 = vsel %vm53_vm3, %v810_v35, %v809_v42 }
  0x17   :  { %590 = vmatpush1.msra.mxu0 %v1102_v6  ;;  %838 = vmatprep.subr.mxu1 %v1079_v2  ;;  %v812_v2 = vrot.slane %v793_v33, 3  ;;  %v565_v44 = vrot.slane %v544_v1, 1 }
  0x18   :  { %591 = vmatprep.subr.mxu0 %v1109_v7  ;;  %839 = vmatpush1.msra.mxu1 %v1088_v4  ;;  %v562_v4 = vsel %vm56_vm4, %v561_v32, %v560_v36 }
  0x19   :  { %592 = vmatpush1.msra.mxu0 %v1114_v8  ;;  %840 = vmatprep.subr.mxu1 %v1095_v5  ;;  %v814_v5 = vrot.slane %v794_v41, 2  ;;  %v564_v47 = vsel %vm59_vm5, %v563_v40, %v562_v4 }
  0x1a   :  { %593 = vmatprep.subr.mxu0 %v1121_v9  ;;  %841 = vmatpush1.msra.mxu1 %v1102_v6  ;;  %v813_v6 = vsel %vm56_vm4, %v812_v2, %v811_v43 }
  0x1b   :  { %594 = vmatpush1.msra.mxu0 %v1126_v10  ;;  %842 = vmatprep.subr.mxu1 %v1109_v7  ;;  %v816_v7 = vrot.slane %v795_v46, 1  ;;  %v815_v48 = vsel %vm59_vm5, %v814_v5, %v813_v6 }
  0x1c   :  { %595 = vmatprep.subr.mxu0 %v1136_v12  ;;  %843 = vmatpush1.msra.mxu1 %v1114_v8  ;;  %v566_v8 = vsel %vm62_vm6, %v565_v44, %v564_v47 }
  0x1d   :  { %596 = vmatpush1.msra.mxu0 %v1152_v16  ;;  %844 = vmatprep.subr.mxu1 %v1121_v9  ;;  %v817_v9 = vsel %vm62_vm6, %v816_v7, %v815_v48 }
  0x1e   :  { %597 = vmatprep.subr.mxu0 %v1168_v20  ;;  %845 = vmatpush1.msra.mxu1 %v1126_v10  ;;  %v1050_v10 = vmov 1966171168  }
  0x1f   :  { %598 = vmatpush1.msra.mxu0 %v1178_v25  ;;  %846 = vmatprep.subr.mxu1 %v1136_v12  ;;  %v143_v12 = vunpack.c.l.s4 %v1050_v10 }
  0x20   :  { %599 = vmatprep.subr.mxu0 %v1212_v39  ;;  %847 = vmatpush1.msra.mxu1 %v1152_v16  ;;  %v145_v16 = vlaneseq }
  0x21   :  { %600 = vmatpush1.msra.mxu0 %v1223_v45  ;;  %848 = vmatprep.subr.mxu1 %v1168_v20  ;;  %v144_v49 = vunpack.c.0.s8 %v143_v12 }
  0x22   :  { %884 = vmatprep.mubr.f32.mxu1 %v1049_v3  ;;  %849 = vmatpush1.msra.mxu1 %v1178_v25  ;;  %v146_v50 = vshrl.u32 %v145_v16, 7 }
  0x23   :  { %1045 = vmatmul.mubr.msk.f32.vlgmr.msra.gmra.mxu0 %vm64_vm7, %v566_v8  ;;  %850 = vmatprep.subr.mxu1 %v1212_v39 }
  0x24   :  { %851 = vmatpush1.msra.mxu1 %v1223_v45  ;;  %v1342_v51 = vsub.s32 %v144_v49, %v146_v50  ;;  %v1346_v55 = vsub.s32 0, %v146_v50  ;;  %v1348_v45 = vsub.s32 1, %v146_v50 }
  0x25   :  { %1046 = vmatmul.mubr.msk.f32.vlgmr.msra.gmra.mxu1 %vm64_vm7, %v817_v9 }
  0xd2   :  { %v133_v20 = vpop.f32.mrf.mxu0 }
  0xd4   :  { %v135_v3 = vpop.f32.mrf.mxu0 }
  0xd5   :  { %v140_v25 = vcombine.low %v133_v20, %v135_v3  ;;  %v141_v52 = vcombine.high %v133_v20, %v135_v3  ;;  %v384_v53 = vpop.f32.mrf.mxu1 }
  0xd7   :  { %v148_v54 = vrot.slane %v140_v25, %v1342_v51  ;;  %v155_v39 = vrot.slane %v141_v52, %v1342_v51  ;;  %v386_v56 = vpop.f32.mrf.mxu1 }
  0xd8   :  { %v391_v61 = vcombine.low %v384_v53, %v386_v56  ;;  %v392_v62 = vcombine.high %v384_v53, %v386_v56 }
  0xd9   :  { %v156_v57 = vcombine.high %v148_v54, %v148_v54  ;;  %v157_v58 = vcombine.high %v155_v39, %v155_v39  ;;  %v164_v59 = vrot.slane %v148_v54, %v1342_v51  ;;  %v171_v60 = vrot.slane %v155_v39, %v1342_v51 }
  0xda   :  { %v399_v35 = vrot.slane %v391_v61, %v1342_v51  ;;  %v406_v36 = vrot.slane %v392_v62, %v1342_v51 }
  0xdb   :  { %v178_v63 = vrot.slane %v156_v57, %v1342_v51  ;;  %v185_v11 = vrot.slane %v157_v58, %v1342_v51  ;;  %v186_v13 = vcombine.high %v164_v59, %v164_v59  ;;  %v187_v14 = vcombine.high %v171_v60, %v171_v60 }
  0xdc   :  { %v193_v15 = vrot.slane %v164_v59, %v1346_v55  ;;  %v197_v17 = vrot.slane %v164_v59, %v1348_v45  ;;  %v225_v18 = vrot.slane %v171_v60, %v1346_v55  ;;  %v229_v19 = vrot.slane %v171_v60, %v1348_v45 }
  0xdd   :  { %v188_v21 = vcombine.high %v178_v63, %v178_v63  ;;  %v189_v22 = vcombine.high %v185_v11, %v185_v11  ;;  %v201_v23 = vrot.slane %v178_v63, %v1346_v55  ;;  %v205_v24 = vrot.slane %v178_v63, %v1348_v45 }
  0xde   :  { %v209_v0 = vrot.slane %v186_v13, %v1346_v55  ;;  %v213_v26 = vrot.slane %v186_v13, %v1348_v45  ;;  %v233_v27 = vrot.slane %v185_v11, %v1346_v55  ;;  %v237_v28 = vrot.slane %v185_v11, %v1348_v45  ;;  %270 = vst [vmem:[%s1636_s2] sm:$0x3] %v193_v15 }
  0xdf   :  { %271 = vst [vmem:[%s1636_s2 + $0x8] sm:$0x3] %v197_v17  ;;  %278 = vst [vmem:[%s1636_s2 + $0x40] sm:$0x3] %v225_v18  ;;  %v217_v29 = vrot.slane %v188_v21, %v1346_v55  ;;  %v221_v30 = vrot.slane %v188_v21, %v1348_v45  ;;  %v241_v31 = vrot.slane %v187_v14, %v1346_v55 }
  0xe0   :  { %279 = vst [vmem:[%s1636_s2 + $0x48] sm:$0x3] %v229_v19  ;;  %v245_v32 = vrot.slane %v187_v14, %v1348_v45  ;;  %272 = vst [vmem:[%s1636_s2 + $0x10] sm:$0x3] %v201_v23  ;;  %v249_v33 = vrot.slane %v189_v22, %v1346_v55  ;;  %v253_v34 = vrot.slane %v189_v22, %v1348_v45 }
  0xe1   :  { %273 = vst [vmem:[%s1636_s2 + $0x18] sm:$0x3] %v205_v24  ;;  %274 = vst [vmem:[%s1636_s2 + $0x20] sm:$0x3] %v209_v0  ;;  %v407_v37 = vcombine.high %v399_v35, %v399_v35  ;;  %v408_v38 = vcombine.high %v406_v36, %v406_v36  ;;  %v415_v1 = vrot.slane %v399_v35, %v1342_v51 }
  0xe2   :  { %275 = vst [vmem:[%s1636_s2 + $0x28] sm:$0x3] %v213_v26  ;;  %280 = vst [vmem:[%s1636_s2 + $0x50] sm:$0x3] %v233_v27  ;;  %v422_v40 = vrot.slane %v406_v36, %v1342_v51 }
  0xe3   :  { %281 = vst [vmem:[%s1636_s2 + $0x58] sm:$0x3] %v237_v28  ;;  %276 = vst [vmem:[%s1636_s2 + $0x30] sm:$0x3] %v217_v29  ;;  %v635_v41 = vpop.f32.mrf.mxu0  ;;  %v429_v42 = vrot.slane %v407_v37, %v1342_v51  ;;  %v436_v2 = vrot.slane %v408_v38, %v1342_v51  ;;  %v437_v4 = vcombine.high %v415_v1, %v415_v1 }
  0xe4   :  { %277 = vst [vmem:[%s1636_s2 + $0x38] sm:$0x3] %v221_v30  ;;  %282 = vst [vmem:[%s1636_s2 + $0x60] sm:$0x3] %v241_v31  ;;  %v438_v43 = vcombine.high %v422_v40, %v422_v40  ;;  %v444_v44 = vrot.slane %v415_v1, %v1346_v55  ;;  %v448_v46 = vrot.slane %v415_v1, %v1348_v45 }
  0xe5   :  { %283 = vst [vmem:[%s1636_s2 + $0x68] sm:$0x3] %v245_v32  ;;  %284 = vst [vmem:[%s1636_s2 + $0x70] sm:$0x3] %v249_v33  ;;  %v476_v5 = vrot.slane %v422_v40, %v1346_v55  ;;  %v480_v47 = vrot.slane %v422_v40, %v1348_v45  ;;  %v439_v6 = vcombine.high %v429_v42, %v429_v42  ;;  %v886_v9 = vpop.f32.mrf.mxu1  ;;  %v637_v10 = vpop.f32.mrf.mxu0 }
  0xe6   :  { %285 = vst [vmem:[%s1636_s2 + $0x78] sm:$0x3] %v253_v34  ;;  %v440_v7 = vcombine.high %v436_v2, %v436_v2  ;;  %v452_v8 = vrot.slane %v429_v42, %v1346_v55  ;;  %v456_v48 = vrot.slane %v429_v42, %v1348_v45  ;;  %v460_v12 = vrot.slane %v437_v4, %v1346_v55 }
  0xe7   :  { %v464_v16 = vrot.slane %v437_v4, %v1348_v45  ;;  %v484_v49 = vrot.slane %v436_v2, %v1346_v55  ;;  %v488_v50 = vrot.slane %v436_v2, %v1348_v45  ;;  %521 = vst [vmem:[%s1636_s2] sm:$0xc] %v444_v44  ;;  %522 = vst [vmem:[%s1636_s2 + $0x8] sm:$0xc] %v448_v46  ;;  %v888_v53 = vpop.f32.mrf.mxu1 }
  0xe8   :  { %529 = vst [vmem:[%s1636_s2 + $0x40] sm:$0xc] %v476_v5  ;;  %530 = vst [vmem:[%s1636_s2 + $0x48] sm:$0xc] %v480_v47  ;;  %v468_v20 = vrot.slane %v439_v6, %v1346_v55  ;;  %v472_v3 = vrot.slane %v439_v6, %v1348_v45  ;;  %v492_v25 = vrot.slane %v438_v43, %v1346_v55 }
  0xe9   :  { %v496_v52 = vrot.slane %v438_v43, %v1348_v45  ;;  %523 = vst [vmem:[%s1636_s2 + $0x10] sm:$0xc] %v452_v8  ;;  %524 = vst [vmem:[%s1636_s2 + $0x18] sm:$0xc] %v456_v48  ;;  %v500_v54 = vrot.slane %v440_v7, %v1346_v55  ;;  %v504_v39 = vrot.slane %v440_v7, %v1348_v45 }
  0xea   :  { %525 = vst [vmem:[%s1636_s2 + $0x20] sm:$0xc] %v460_v12  ;;  %526 = vst [vmem:[%s1636_s2 + $0x28] sm:$0xc] %v464_v16  ;;  %v642_v56 = vcombine.low %v635_v41, %v637_v10  ;;  %v643_v57 = vcombine.high %v635_v41, %v637_v10  ;;  %v893_v58 = vcombine.low %v886_v9, %v888_v53 }
  0xeb   :  { %531 = vst [vmem:[%s1636_s2 + $0x50] sm:$0xc] %v484_v49  ;;  %532 = vst [vmem:[%s1636_s2 + $0x58] sm:$0xc] %v488_v50  ;;  %v894_v59 = vcombine.high %v886_v9, %v888_v53 }
  0xec   :  { %527 = vst [vmem:[%s1636_s2 + $0x30] sm:$0xc] %v468_v20  ;;  %528 = vst [vmem:[%s1636_s2 + $0x38] sm:$0xc] %v472_v3  ;;  %v650_v60 = vrot.slane %v642_v56, %v1342_v51  ;;  %v657_v61 = vrot.slane %v643_v57, %v1342_v51  ;;  %v901_v62 = vrot.slane %v893_v58, %v1342_v51 }
  0xed   :  { %533 = vst [vmem:[%s1636_s2 + $0x60] sm:$0xc] %v492_v25  ;;  %534 = vst [vmem:[%s1636_s2 + $0x68] sm:$0xc] %v496_v52  ;;  %v908_v63 = vrot.slane %v894_v59, %v1342_v51 }
  0xee   :  { %535 = vst [vmem:[%s1636_s2 + $0x70] sm:$0xc] %v500_v54  ;;  %536 = vst [vmem:[%s1636_s2 + $0x78] sm:$0xc] %v504_v39  ;;  %v658_v11 = vcombine.high %v650_v60, %v650_v60  ;;  %v659_v13 = vcombine.high %v657_v61, %v657_v61  ;;  %v666_v14 = vrot.slane %v650_v60, %v1342_v51 }
  0xef   :  { %v673_v15 = vrot.slane %v657_v61, %v1342_v51  ;;  %v909_v17 = vcombine.high %v901_v62, %v901_v62  ;;  %v910_v18 = vcombine.high %v908_v63, %v908_v63  ;;  %v917_v19 = vrot.slane %v901_v62, %v1342_v51 }
  0xf0   :  { %v1496_v21 = vrot.slane %v908_v63, %v1342_v51  ;;  %v680_v22 = vrot.slane %v658_v11, %v1342_v51  ;;  %v687_v23 = vrot.slane %v659_v13, %v1342_v51  ;;  %v688_v24 = vcombine.high %v666_v14, %v666_v14 }
  0xf1   :  { %v689_v0 = vcombine.high %v673_v15, %v673_v15  ;;  %v695_v26 = vrot.slane %v666_v14, %v1346_v55  ;;  %v699_v27 = vrot.slane %v666_v14, %v1348_v45  ;;  %v727_v28 = vrot.slane %v673_v15, %v1346_v55 }
  0xf2   :  { %v731_v29 = vrot.slane %v673_v15, %v1348_v45  ;;  %v690_v30 = vcombine.high %v680_v22, %v680_v22  ;;  %v691_v31 = vcombine.high %v687_v23, %v687_v23  ;;  %v703_v32 = vrot.slane %v680_v22, %v1346_v55 }
  0xf3   :  { %v707_v33 = vrot.slane %v680_v22, %v1348_v45  ;;  %v711_v34 = vrot.slane %v688_v24, %v1346_v55  ;;  %v715_v35 = vrot.slane %v688_v24, %v1348_v45  ;;  %v735_v36 = vrot.slane %v687_v23, %v1346_v55  ;;  %772 = vst [vmem:[%s1636_s2] sm:$0x30] %v695_v26 }
  0xf4   :  { %v739_v37 = vrot.slane %v687_v23, %v1348_v45  ;;  %773 = vst [vmem:[%s1636_s2 + $0x8] sm:$0x30] %v699_v27  ;;  %780 = vst [vmem:[%s1636_s2 + $0x40] sm:$0x30] %v727_v28  ;;  %v719_v38 = vrot.slane %v690_v30, %v1346_v55  ;;  %v723_v1 = vrot.slane %v690_v30, %v1348_v45 }
  0xf5   :  { %781 = vst [vmem:[%s1636_s2 + $0x48] sm:$0x30] %v731_v29  ;;  %v743_v40 = vrot.slane %v689_v0, %v1346_v55  ;;  %v747_v41 = vrot.slane %v689_v0, %v1348_v45  ;;  %774 = vst [vmem:[%s1636_s2 + $0x10] sm:$0x30] %v703_v32  ;;  %v751_v42 = vrot.slane %v691_v31, %v1346_v55 }
  0xf6   :  { %775 = vst [vmem:[%s1636_s2 + $0x18] sm:$0x30] %v707_v33  ;;  %v755_v2 = vrot.slane %v691_v31, %v1348_v45  ;;  %776 = vst [vmem:[%s1636_s2 + $0x20] sm:$0x30] %v711_v34  ;;  %v931_v4 = vrot.slane %v909_v17, %v1342_v51  ;;  %v938_v43 = vrot.slane %v910_v18, %v1342_v51 }
  0xf7   :  { %777 = vst [vmem:[%s1636_s2 + $0x28] sm:$0x30] %v715_v35  ;;  %782 = vst [vmem:[%s1636_s2 + $0x50] sm:$0x30] %v735_v36  ;;  %v939_v44 = vcombine.high %v917_v19, %v917_v19  ;;  %v940_v51 = vcombine.high %v1496_v21, %v1496_v21  ;;  %v946_v46 = vrot.slane %v917_v19, %v1346_v55 }
  0xf8   :  { %783 = vst [vmem:[%s1636_s2 + $0x58] sm:$0x30] %v739_v37  ;;  %778 = vst [vmem:[%s1636_s2 + $0x30] sm:$0x30] %v719_v38  ;;  %v950_v5 = vrot.slane %v917_v19, %v1348_v45  ;;  %v941_v47 = vcombine.high %v931_v4, %v931_v4  ;;  %v942_v6 = vcombine.high %v938_v43, %v938_v43 }
  0xf9   :  { %779 = vst [vmem:[%s1636_s2 + $0x38] sm:$0x30] %v723_v1  ;;  %784 = vst [vmem:[%s1636_s2 + $0x60] sm:$0x30] %v743_v40  ;;  %v954_v7 = vrot.slane %v931_v4, %v1346_v55  ;;  %v958_v8 = vrot.slane %v931_v4, %v1348_v45  ;;  %v962_v48 = vrot.slane %v939_v44, %v1346_v55 }
  0xfa   :  { %785 = vst [vmem:[%s1636_s2 + $0x68] sm:$0x30] %v747_v41  ;;  %786 = vst [vmem:[%s1636_s2 + $0x70] sm:$0x30] %v751_v42  ;;  %v966_v9 = vrot.slane %v939_v44, %v1348_v45  ;;  %v978_v10 = vrot.slane %v1496_v21, %v1346_v55  ;;  %v982_v12 = vrot.slane %v1496_v21, %v1348_v45 }
  0xfb   :  { %787 = vst [vmem:[%s1636_s2 + $0x78] sm:$0x30] %v755_v2  ;;  %1023 = vst [vmem:[%s1636_s2] sm:$0xc0] %v946_v46  ;;  %v970_v16 = vrot.slane %v941_v47, %v1346_v55  ;;  %v974_v49 = vrot.slane %v941_v47, %v1348_v45  ;;  %v986_v50 = vrot.slane %v938_v43, %v1346_v55 }
  0xfc   :  { %1024 = vst [vmem:[%s1636_s2 + $0x8] sm:$0xc0] %v950_v5  ;;  %v990_v20 = vrot.slane %v938_v43, %v1348_v45  ;;  %1025 = vst [vmem:[%s1636_s2 + $0x10] sm:$0xc0] %v954_v7  ;;  %v994_v3 = vrot.slane %v940_v51, %v1346_v55  ;;  %v998_v25 = vrot.slane %v940_v51, %v1348_v45 }
  0xfd   :  { %1026 = vst [vmem:[%s1636_s2 + $0x18] sm:$0xc0] %v958_v8  ;;  %v1002_v52 = vrot.slane %v942_v6, %v1346_v55  ;;  %v1006_v53 = vrot.slane %v942_v6, %v1348_v45  ;;  %1027 = vst [vmem:[%s1636_s2 + $0x20] sm:$0xc0] %v962_v48 }
  0xfe   :  { %1028 = vst [vmem:[%s1636_s2 + $0x28] sm:$0xc0] %v966_v9  ;;  %1031 = vst [vmem:[%s1636_s2 + $0x40] sm:$0xc0] %v978_v10 }
  0xff   :  { %1032 = vst [vmem:[%s1636_s2 + $0x48] sm:$0xc0] %v982_v12  ;;  %1029 = vst [vmem:[%s1636_s2 + $0x30] sm:$0xc0] %v970_v16 }
 0x100   :  { %1030 = vst [vmem:[%s1636_s2 + $0x38] sm:$0xc0] %v974_v49  ;;  %1033 = vst [vmem:[%s1636_s2 + $0x50] sm:$0xc0] %v986_v50 }
 0x101   :  { %1034 = vst [vmem:[%s1636_s2 + $0x58] sm:$0xc0] %v990_v20  ;;  %1035 = vst [vmem:[%s1636_s2 + $0x60] sm:$0xc0] %v994_v3 }
 0x102   :  { %1036 = vst [vmem:[%s1636_s2 + $0x68] sm:$0xc0] %v998_v25  ;;  %1037 = vst [vmem:[%s1636_s2 + $0x70] sm:$0xc0] %v1002_v52 }
 0x103   :  { %1038 = vst [vmem:[%s1636_s2 + $0x78] sm:$0xc0] %v1006_v53 }

</bundles_post_ra>
